<compile_context>
chip_gen: v5e
topology: v5e:2x2
jax: 0.10.0
libtpu: 0.0.40
codegen_flags: <defaults>
</compile_context>

<pallas_src>
import jax
import jax.numpy as jnp
from jax.experimental import pallas as pl
from jax.experimental.pallas import tpu as pltpu

_ROW_ALIGN = 16        # row-tile multiple (covers f32 (8,128) and bf16 (16,128))
_MIN_GRID_STEPS = 8    # give v7x's 2 TensorCores several blocks each
_MAX_TILE_ROWS = 8192


def _softmax_rows_kernel(x_ref, o_ref):
    # x_ref / o_ref: (tR, H) tile of independent rows; softmax over lanes.
    x = x_ref[...].astype(jnp.float32)
    x = x - jnp.max(x, axis=-1, keepdims=True)   # cross-lane max -> XLU
    x = jnp.exp(x)                               # EUP; reuse the same temp
    denom = jnp.sum(x, axis=-1, keepdims=True)   # cross-lane sum -> XLU
    o_ref[...] = (x / denom).astype(o_ref.dtype)


def _round_up(v, m):
    return ((v + m - 1) // m) * m


def encoder_forward(x, *, target_block_bytes=4 * 1024 * 1024):
    """Softmax over the last axis of `x`, as a tiled Pallas TPU kernel."""
    orig_shape = x.shape
    H = orig_shape[-1]
    R = 1
    for d in orig_shape[:-1]:
        R *= int(d)
    R = max(R, 1)

    # Integer inputs: compute and emit in float32 (softmax of ints back to an
    # int dtype would truncate everything to 0/1).
    out_dtype = x.dtype if jnp.issubdtype(x.dtype, jnp.floating) else jnp.float32

    x2 = x.reshape(R, H)
    itemsize = jnp.dtype(x.dtype).itemsize
    bytes_per_row = max(H * itemsize, 1)

    # Row tile: as many rows as fit in ~target_block_bytes, 16-row aligned.
    rows_fit = max(_ROW_ALIGN, target_block_bytes // bytes_per_row)
    tR = max(_ROW_ALIGN, (int(rows_fit) // _ROW_ALIGN) * _ROW_ALIGN)
    tR = min(tR, _MAX_TILE_ROWS)

    # Keep enough grid steps for megacore sharding on large inputs.
    if R >= _MIN_GRID_STEPS * _ROW_ALIGN:
        tR = min(tR, _round_up(pl.cdiv(R, _MIN_GRID_STEPS), _ROW_ALIGN))

    # If one block covers everything, use the full (always-legal) extent.
    if tR >= R:
        tR = R

    grid = (pl.cdiv(R, tR),)

    cost = pl.CostEstimate(
        flops=5 * R * H,                     # sub, exp-adjacent muls, sum, div
        transcendentals=R * H,               # exp
        bytes_accessed=2 * R * H * itemsize,
    )

    out = pl.pallas_call(
        _softmax_rows_kernel,
        out_shape=jax.ShapeDtypeStruct((R, H), out_dtype),
        grid_spec=pltpu.PrefetchScalarGridSpec(
            num_scalar_prefetch=0,
            grid=grid,
            in_specs=[pl.BlockSpec((tR, H), lambda i: (i, 0))],
            out_specs=pl.BlockSpec((tR, H), lambda i: (i, 0)),
        ),
        compiler_params=pltpu.CompilerParams(
            dimension_semantics=("parallel",),
            vmem_limit_bytes=32 * 1024 * 1024,
        ),
        cost_estimate=cost,
    )(x2)

    return out.reshape(orig_shape)


if __name__ == "__main__":
    key = jax.random.PRNGKey(0)
    # Small shapes consistent with an encoder activation: batch=2, seq=8, hidden=32.
    x = jax.random.normal(key, (2, 8, 32), dtype=jnp.float32)

    out = encoder_forward(x)
    out = jax.block_until_ready(out)

    # Sanity check against plain-JAX softmax (same semantics as
    # torch.nn.functional.softmax(x, dim=-1)).
    ref = jax.nn.softmax(x, axis=-1)
    assert out.shape == x.shape
    assert jnp.allclose(out, ref, atol=1e-5, rtol=1e-5)

    print("KERNEL_OK")
</pallas_src>

<mosaic_0001>
module attributes {stable_mosaic.version = 11 : i64} {
  func.func @_softmax_rows_kernel(%arg0: i32, %arg1: memref<16x32xf32, #tpu.memory_space<vmem>>, %arg2: memref<16x32xf32, #tpu.memory_space<vmem>>) attributes {dimension_semantics = [#tpu.dimension_semantics<parallel>], iteration_bounds = array<i64: 1>, scalar_prefetch = 0 : i64, scratch_operands = 0 : i64, tpu.core_type = #tpu.core_type<tc>, window_params = [{transform_indices = @transform_0, window_bounds = array<i64: 16, 32>}, {transform_indices = @transform_1, window_bounds = array<i64: 16, 32>}]} {
    %c0 = arith.constant 0 : index
    %c0_0 = arith.constant 0 : index
    %0 = vector.load %arg1[%c0, %c0_0] : memref<16x32xf32, #tpu.memory_space<vmem>>, vector<16x32xf32>
    %cst = arith.constant dense<0xFF800000> : vector<16xf32>
    %1 = vector.multi_reduction <maximumf>, %0, %cst [1] : vector<16x32xf32> to vector<16xf32>
    %2 = vector.shape_cast %1 : vector<16xf32> to vector<16x1xf32>
    %3 = vector.broadcast %2 : vector<16x1xf32> to vector<16x32xf32>
    %4 = arith.subf %0, %3 : vector<16x32xf32>
    %5 = math.exp %4 : vector<16x32xf32>
    %cst_1 = arith.constant dense<0.000000e+00> : vector<16xf32>
    %6 = vector.multi_reduction <add>, %5, %cst_1 [1] : vector<16x32xf32> to vector<16xf32>
    %7 = vector.shape_cast %6 : vector<16xf32> to vector<16x1xf32>
    %8 = vector.broadcast %7 : vector<16x1xf32> to vector<16x32xf32>
    %9 = arith.divf %5, %8 : vector<16x32xf32>
    %c0_2 = arith.constant 0 : index
    %c0_3 = arith.constant 0 : index
    %10 = vector.load %arg2[%c0_2, %c0_3] : memref<16x32xf32, #tpu.memory_space<vmem>>, vector<16x32xf32>
    tpu.vector_store %arg2[%c0_2, %c0_3], %9 {strides = array<i32>} : memref<16x32xf32, #tpu.memory_space<vmem>>, vector<16x32xf32>,
    return
  }
  func.func @transform_0(%arg0: i32) -> (i32, i32) {
    %c0_i32 = arith.constant 0 : i32
    %c0_i32_0 = arith.constant 0 : i32
    return %arg0, %c0_i32 : i32, i32
  }
  func.func @transform_1(%arg0: i32) -> (i32, i32) {
    %c0_i32 = arith.constant 0 : i32
    %c0_i32_0 = arith.constant 0 : i32
    return %arg0, %c0_i32 : i32, i32
  }
}

</mosaic_0001>

<bundles_post_ra>
// kernel: tpu_custom_call.1
= control target key start
LH: loop header
LB: loop body
LE: loop exit
PB: predicated region body
PF: predicated region fallthrough
CT: control target
= control target key end

     0   :  { %6 = vsyncpa [#allocation3], 0  ;;  %s193_s0 = inlined_call_operand.hbm [shape: f32[16,32], index: 0, kind: input, shape index: {}]   ;;  %s194_s1 = inlined_call_operand.hbm [shape: f32[16,32], index: 1, kind: output, shape index: {}]  }
   0x1   :  { %7 = vsyncpa [#allocation4], 0  ;;  %s12_s8 = sshll.u32 %s193_s0, 4  ;;  %s161_s9 = smov [#allocation2]   ;;  %s13_s8 = int_to_ptr.hbm [resolvable:$true] %s12_s8 }
   0x2   :  { %s14_s10 = sshll.u32 %s161_s9, 4  ;;  %s162_s11 = smov 128   ;;  %s15_s10 = int_to_ptr.vmem [resolvable:$true] %s14_s10 }
   0x3   :  { %s163_s12 = smov 8  }
   0x4   :  { %20 = dma.hbm_to_vmem [thread:$0]  %s13_s8, 256, %s15_s10, [#allocation3], %s162_s11, %s162_s11, %s163_s12  }
   0x5   :  { %157 = dma.done.wait [#allocation3], 256  }
   0x6   :  { %158 = vsyncadd [#allocation3], 4294967040  ;;  %vm27_vm0 = vcmask 261120   ;;  %v25_v0 = vld [vmem:[#allocation2] sm:$0xff]  ;;  %v26_v2 = vld [vmem:[#allocation2 + $0x8] sm:$0xff]  ;;  %s164_s0 = smov [#allocation5]  }
   0x7   :  { %v28_v1 = vsel %vm27_vm0, %v25_v0, -inf  ;;  %v31_v3 = vsel %vm27_vm0, %v26_v2, -inf  ;;  %s82_s13 = sshll.u32 %s164_s0, 4  ;;  %s84_s16 = sshll.u32 %s194_s1, 4  ;;  %s83_s13 = int_to_ptr.vmem [resolvable:$true] %s82_s13  ;;  %s85_s16 = int_to_ptr.hbm [resolvable:$true] %s84_s16 }
   0x8   :  { %29 = vmax.xlane.f32.xlu0 %v28_v1 }
  0x10   :  { %32 = vmax.xlane.f32.xlu0 %v31_v3 }
  0x7b   :  { %v30_v4 = vpop.xlane.xlu0 %29 }
  0x7c   :  { %v34_v5 = vsub.f32 %v25_v0, %v30_v4 }
  0x7e   :  { %v36_v6 = vmul.f32 1.442695, %v34_v5 }
  0x80   :  { %101 = vpow2.f32 %v36_v6 }
  0x83   :  { %v33_v7 = vpop.xlane.xlu0 %32 }
  0x84   :  { %v35_v8 = vsub.f32 %v26_v2, %v33_v7 }
  0x86   :  { %v102_v9 = vpop.eup %101  ;;  %v38_v10 = vmul.f32 1.442695, %v35_v8 }
  0x87   :  { %v40_v11 = vsel %vm27_vm0, %v102_v9, 0.0 }
  0x88   :  { %103 = vpow2.f32 %v38_v10  ;;  %41 = vadd.xlane.f32.xlu1 %v40_v11 }
  0x8e   :  { %v104_v12 = vpop.eup %103 }
  0x8f   :  { %v43_v13 = vsel %vm27_vm0, %v104_v12, 0.0 }
  0x90   :  { %44 = vadd.xlane.f32.xlu1 %v43_v13 }
  0xfb   :  { %v42_v14 = vpop.xlane.xlu1 %41 }
  0xfc   :  { %105 = vrcp.f32 %v42_v14  ;;  %v57_v19 = vand.u32 2147483648, %v42_v14  ;;  %v55_v21 = vand.u32 2147483647, %v42_v14  ;;  %vm51_vm2 = vweird.f32 %v42_v14 }
  0xfe   :  { %v58_v24 = vor.u32 1.1754944e-38, %v57_v19  ;;  %vm56_vm4 = vcmp.eq.f32.partialorder %v55_v21, 8.507059e+37 }
 0x102   :  { %v106_v15 = vpop.eup %105 }
 0x103   :  { %v47_v16 = vmul.f32 %v106_v15, %v42_v14  ;;  %v45_v17 = vpop.xlane.xlu1 %44  ;;  %vm52_vm1 = vweird.f32 %v106_v15 }
 0x104   :  { %107 = vrcp.f32 %v45_v17  ;;  %vm53_vm3 = vmor %vm51_vm2, %vm52_vm1  ;;  %v72_v30 = vand.u32 2147483648, %v45_v17  ;;  %v70_v32 = vand.u32 2147483647, %v45_v17  ;;  %vm66_vm6 = vweird.f32 %v45_v17 }
 0x105   :  { %v48_v18 = vsub.f32 1.0, %v47_v16 }
 0x106   :  { %v73_v34 = vor.u32 1.1754944e-38, %v72_v30  ;;  %vm71_vm8 = vcmp.eq.f32.partialorder %v70_v32, 8.507059e+37 }
 0x107   :  { %v49_v20 = vmul.f32 %v106_v15, %v48_v18 }
 0x109   :  { %v50_v22 = vadd.f32 %v106_v15, %v49_v20 }
 0x10a   :  { %v108_v23 = vpop.eup %107 }
 0x10b   :  { %v54_v25 = vsel %vm53_vm3, %v106_v15, %v50_v22  ;;  %v62_v26 = vmul.f32 %v108_v23, %v45_v17  ;;  %vm67_vm5 = vweird.f32 %v108_v23 }
 0x10c   :  { %v59_v27 = vsel %vm56_vm4, %v58_v24, %v54_v25  ;;  %vm68_vm7 = vmor %vm66_vm6, %vm67_vm5 }
 0x10d   :  { %v63_v28 = vsub.f32 1.0, %v62_v26  ;;  %v60_v29 = vmul.f32 %v102_v9, %v59_v27 }
 0x10f   :  { %v64_v31 = vmul.f32 %v108_v23, %v63_v28  ;;  %76 = vst.msk [vmem:[#allocation5] sm:$0xff] %vm27_vm0, %v60_v29 }
 0x111   :  { %v65_v33 = vadd.f32 %v108_v23, %v64_v31 }
 0x113   :  { %v69_v35 = vsel %vm68_vm7, %v108_v23, %v65_v33 }
 0x114   :  { %v74_v36 = vsel %vm71_vm8, %v73_v34, %v69_v35 }
 0x115   :  { %v75_v37 = vmul.f32 %v104_v12, %v74_v36 }
 0x117   :  { %77 = vst.msk [vmem:[#allocation5 + $0x8] sm:$0xff] %vm27_vm0, %v75_v37 }
 0x118   :  { %90 = dma.vmem_to_hbm [thread:$0]  %s83_s13, 256, %s85_s16, [#allocation4], %s162_s11, %s162_s11, %s163_s12  }
 0x119   :  { %159 = dma.done.wait [#allocation4], 256  }
 0x11a   :  { %160 = vsyncadd [#allocation4], 4294967040 }
 0x11b   :  { %95 = vsyncpa [#allocation3], 1 }
 0x11c   :  { %96 = vsyncpa [#allocation4], 1 }

</bundles_post_ra>
